<compile_context>
chip_gen: v7x
topology: tpu7x:2x2x1
jax: 0.10.0
libtpu: 0.0.40
codegen_flags: <defaults>
</compile_context>

<pallas_src>
import functools

import jax
import jax.numpy as jnp
import numpy as np
from jax import lax
from jax.experimental import pallas as pl
from jax.experimental.pallas import tpu as pltpu


def _km2x2_kernel(H, W, x_ref, w1_ref, b1_ref, w2_ref, b2_ref, o_ref):
    # x_ref : (1, C1, H*W)   one NCHW image, spatial flattened onto lanes
    # w1_ref: (Cm, 4*C1)     tap-stacked conv1 weights, row = tap*C1 + c1,
    #                        tap = di*2 + dj
    # b1_ref: (Cm, 1)
    # w2_ref: (C2, 4*Cm)     tap-stacked conv2 weights
    # b2_ref: (C2, 1)
    # o_ref : (1, C2, H*W)   NCHW-flattened output (lane-dense store)
    C1 = x_ref.shape[1]
    Cm = w1_ref.shape[0]
    HW = H * W
    L1 = (H - 1) * W                 # conv1 evaluated for h in [0, H-2], all w
    taps = (0, 1, W, W + 1)          # flat shifts for (di, dj) row-major

    # ---- conv1 (VALID): one merged-tap matmul ------------------------------
    x = x_ref[0].astype(jnp.float32)                          # (C1, H*W)
    # one extra zero row so the (W+1)-shifted tap slice stays in bounds
    x_ext = jnp.concatenate(
        [x, jnp.zeros((C1, W), jnp.float32)], axis=1)         # (C1, H*W + W)
    x4 = jnp.concatenate(
        [x_ext[:, s:s + L1] for s in taps], axis=0)           # (4*C1, L1)
    y1 = (jnp.dot(w1_ref[...], x4, preferred_element_type=jnp.float32)
          + b1_ref[...])                                      # (Cm, L1)
    # lanes with w == W-1 are not valid conv1 outputs (width is W-1); they
    # must be exactly zero because they become pad columns of the
    # intermediate below.
    col = lax.broadcasted_iota(jnp.int32, (Cm, L1), 1) % W
    y1 = jnp.where(col != W - 1, y1, 0.0)

    # ---- conv2's padding=1 as values (no scratch) ---------------------------
    # Padded conv1 output, flattened with row stride W: rows 0, H, H+1 and
    # column 0 are zero; data sits at rows 1..H-1, cols 1..W-1.  Because both
    # pad columns are zero, dj=+1 taps that wrap into the next row's column 0
    # read exactly the zero they are supposed to read.
    mid = jnp.concatenate(
        [jnp.zeros((Cm, W + 1), jnp.float32),                 # top pad + col 0
         y1,                                                  # data (masked)
         jnp.zeros((Cm, 2 * W - 1), jnp.float32)],            # bottom pad rows
        axis=1)                                               # (Cm, (H+2)*W)

    # ---- conv2 (pad=1): one merged-tap matmul ------------------------------
    m4 = jnp.concatenate(
        [mid[:, s:s + HW] for s in taps], axis=0)             # (4*Cm, H*W)
    out = (jnp.dot(w2_ref[...], m4, preferred_element_type=jnp.float32)
           + b2_ref[...])                                     # (C2, H*W)

    # single lane-dense slab store of the whole output image
    o_ref[0] = out.astype(o_ref.dtype)


def km2x2_pallas(x_flat, w1s, b1c, w2s, b2c, H, W):
    """Fused km2x2 on NCHW-flattened activations (N, C1, H*W) -> (N, C2, H*W)."""
    N, C1, HW = x_flat.shape
    Cm = w1s.shape[0]
    C2 = w2s.shape[0]
    kernel = functools.partial(_km2x2_kernel, H, W)

    return pl.pallas_call(
        kernel,
        out_shape=jax.ShapeDtypeStruct((N, C2, HW), x_flat.dtype),
        grid_spec=pltpu.PrefetchScalarGridSpec(
            num_scalar_prefetch=0,
            grid=(N,),
            in_specs=[
                pl.BlockSpec((1, C1, HW), lambda n: (n, 0, 0)),
                pl.BlockSpec((Cm, 4 * C1), lambda n: (0, 0)),
                pl.BlockSpec((Cm, 1), lambda n: (0, 0)),
                pl.BlockSpec((C2, 4 * Cm), lambda n: (0, 0)),
                pl.BlockSpec((C2, 1), lambda n: (0, 0)),
            ],
            out_specs=pl.BlockSpec((1, C2, HW), lambda n: (n, 0, 0)),
        ),
        # Images are independent: "parallel" lets v7x shard the batch grid
        # across its 2 TensorCores; near-zero cost on single-TC v5e/v6e.
        compiler_params=pltpu.CompilerParams(
            dimension_semantics=("parallel",)),
    )(x_flat, w1s, b1c, w2s, b2c)


def km2x2_forward(x_nchw, w1, b1, w2, b2):
    """Full km2x2 forward: NCHW in, NCHW out (matches the PyTorch module)."""
    N, C1, H, W = x_nchw.shape
    Cm = w1.shape[0]
    C2 = w2.shape[0]
    # (Cout, Cin, 2, 2) -> (Cout, 2, 2, Cin) -> (Cout, 4*Cin), row = tap*Cin+cin
    w1s = jnp.transpose(w1, (0, 2, 3, 1)).reshape(Cm, 4 * C1).astype(jnp.float32)
    w2s = jnp.transpose(w2, (0, 2, 3, 1)).reshape(C2, 4 * Cm).astype(jnp.float32)
    b1c = b1.reshape(Cm, 1).astype(jnp.float32)
    b2c = b2.reshape(C2, 1).astype(jnp.float32)

    x_flat = x_nchw.reshape(N, C1, H * W)        # free, layout-preserving
    y = km2x2_pallas(x_flat, w1s, b1c, w2s, b2c, H, W)
    return y.reshape(N, C2, H, W)                # free, layout-preserving


def _torch_like_conv_init(key, cout, cin, kh, kw):
    # Deterministic stand-in for nn.Conv2d default init: U(-sqrt(k), sqrt(k)),
    # k = 1/(cin*kh*kw).
    kw_, kb_ = jax.random.split(key)
    bound = 1.0 / np.sqrt(cin * kh * kw)
    w = jax.random.uniform(kw_, (cout, cin, kh, kw), jnp.float32, -bound, bound)
    b = jax.random.uniform(kb_, (cout,), jnp.float32, -bound, bound)
    return w, b


def _reference(x, w1, b1, w2, b2):
    dn = ("NCHW", "OIHW", "NCHW")
    y = lax.conv_general_dilated(x, w1, (1, 1), "VALID", dimension_numbers=dn)
    y = y + b1[None, :, None, None]
    y = lax.conv_general_dilated(y, w2, (1, 1), [(1, 1), (1, 1)],
                                 dimension_numbers=dn)
    return y + b2[None, :, None, None]


if __name__ == "__main__":
    c1, c2 = 4, 4
    c = c1 * c2 // (c1 + c2)          # = 2
    N, H, W = 2, 16, 16

    key = jax.random.PRNGKey(0)
    kx, k1, k2 = jax.random.split(key, 3)
    x = jax.random.normal(kx, (N, c1, H, W), jnp.float32)
    w1, b1 = _torch_like_conv_init(k1, c, c1, 2, 2)     # conv1: c1 -> c
    w2, b2 = _torch_like_conv_init(k2, c2, c, 2, 2)     # conv2: c  -> c2

    out = jax.jit(km2x2_forward)(x, w1, b1, w2, b2)
    out = jax.block_until_ready(out)

    ref = _reference(x, w1, b1, w2, b2)
    np.testing.assert_allclose(np.asarray(out), np.asarray(ref),
                               rtol=1e-5, atol=1e-5)
    assert out.shape == (N, c2, H, W)
    print("KERNEL_OK")
</pallas_src>

<mosaic_0001>
module attributes {stable_mosaic.version = 11 : i64} {
  func.func @_km2x2_kernel(%arg0: i32, %arg1: memref<1x4x256xf32, #tpu.memory_space<vmem>>, %arg2: memref<2x16xf32, #tpu.memory_space<vmem>>, %arg3: memref<2x1xf32, #tpu.memory_space<vmem>>, %arg4: memref<4x8xf32, #tpu.memory_space<vmem>>, %arg5: memref<4x1xf32, #tpu.memory_space<vmem>>, %arg6: memref<1x4x256xf32, #tpu.memory_space<vmem>>) attributes {dimension_semantics = [#tpu.dimension_semantics<parallel>], iteration_bounds = array<i64: 2>, scalar_prefetch = 0 : i64, scratch_operands = 0 : i64, tpu.core_type = #tpu.core_type<tc>, window_params = [{transform_indices = @transform_0, window_bounds = array<i64: 1, 4, 256>}, {pipeline_mode = #tpu.pipeline_mode<synchronous>, transform_indices = @transform_1, window_bounds = array<i64: 2, 16>}, {pipeline_mode = #tpu.pipeline_mode<synchronous>, transform_indices = @transform_2, window_bounds = array<i64: 2, 1>}, {pipeline_mode = #tpu.pipeline_mode<synchronous>, transform_indices = @transform_3, window_bounds = array<i64: 4, 8>}, {pipeline_mode = #tpu.pipeline_mode<synchronous>, transform_indices = @transform_4, window_bounds = array<i64: 4, 1>}, {transform_indices = @transform_5, window_bounds = array<i64: 1, 4, 256>}]} {
    %c0 = arith.constant 0 : index
    %c0_0 = arith.constant 0 : index
    %c0_1 = arith.constant 0 : index
    %0 = vector.load %arg1[%c0, %c0_0, %c0_1] : memref<1x4x256xf32, #tpu.memory_space<vmem>>, vector<1x4x256xf32>
    %1 = vector.shape_cast %0 : vector<1x4x256xf32> to vector<4x256xf32>
    %cst = arith.constant 0.000000e+00 : f32
    %2 = vector.broadcast %cst : f32 to vector<4x16xf32>
    %3 = tpu.concatenate %1, %2 in 1 : vector<4x256xf32>, vector<4x16xf32> -> vector<4x272xf32>
    %4 = vector.extract_strided_slice %3 {offsets = [0, 0], sizes = [4, 240], strides = [1, 1]} : vector<4x272xf32> to vector<4x240xf32>
    %5 = vector.extract_strided_slice %3 {offsets = [0, 1], sizes = [4, 240], strides = [1, 1]} : vector<4x272xf32> to vector<4x240xf32>
    %6 = vector.extract_strided_slice %3 {offsets = [0, 16], sizes = [4, 240], strides = [1, 1]} : vector<4x272xf32> to vector<4x240xf32>
    %7 = vector.extract_strided_slice %3 {offsets = [0, 17], sizes = [4, 240], strides = [1, 1]} : vector<4x272xf32> to vector<4x240xf32>
    %8 = tpu.concatenate %4, %5, %6, %7 in 0 : vector<4x240xf32>, vector<4x240xf32>, vector<4x240xf32>, vector<4x240xf32> -> vector<16x240xf32>
    %c0_2 = arith.constant 0 : index
    %c0_3 = arith.constant 0 : index
    %9 = vector.load %arg2[%c0_2, %c0_3] : memref<2x16xf32, #tpu.memory_space<vmem>>, vector<2x16xf32>
    %cst_4 = arith.constant dense<0.000000e+00> : vector<2x240xf32>
    %10 = tpu.matmul %9, %8, %cst_4 {dimension_numbers = #tpu.dot_dimension_numbers<[1], [0], [0], [1], [0, 0, 1, 1], [], []>} : vector<2x16xf32>, vector<16x240xf32>, vector<2x240xf32> -> vector<2x240xf32>
    %c0_5 = arith.constant 0 : index
    %c0_6 = arith.constant 0 : index
    %11 = vector.load %arg3[%c0_5, %c0_6] : memref<2x1xf32, #tpu.memory_space<vmem>>, vector<2x1xf32>
    %12 = vector.broadcast %11 : vector<2x1xf32> to vector<2x240xf32>
    %13 = arith.addf %10, %12 : vector<2x240xf32>
    %14 = tpu.iota {dimensions = array<i32: 1>} : vector<2x240xi32>
    %c16_i32 = arith.constant 16 : i32
    %c0_i32 = arith.constant 0 : i32
    %15 = arith.cmpi eq, %c16_i32, %c0_i32 : i32
    %c1_i32 = arith.constant 1 : i32
    %16 = arith.select %15, %c1_i32, %c16_i32 : i32
    %17 = vector.broadcast %16 : i32 to vector<2x240xi32>
    %18 = arith.remsi %14, %17 : vector<2x240xi32>
    %c0_i32_7 = arith.constant 0 : i32
    %19 = vector.broadcast %c0_i32_7 : i32 to vector<2x240xi32>
    %20 = arith.cmpi ne, %18, %19 : vector<2x240xi32>
    %c0_i32_8 = arith.constant 0 : i32
    %21 = vector.broadcast %c0_i32_8 : i32 to vector<2x240xi32>
    %22 = arith.cmpi slt, %18, %21 : vector<2x240xi32>
    %c0_i32_9 = arith.constant 0 : i32
    %23 = arith.cmpi slt, %16, %c0_i32_9 : i32
    %24 = vector.broadcast %23 : i1 to vector<2x240xi1>
    %25 = vector.broadcast %24 : vector<2x240xi1> to vector<2x240xi1>
    %26 = arith.xori %22, %25 : vector<2x240xi1>
    %27 = arith.andi %26, %20 : vector<2x240xi1>
    %28 = vector.broadcast %16 : i32 to vector<2x240xi32>
    %29 = arith.addi %18, %28 : vector<2x240xi32>
    %30 = arith.select %27, %29, %18 : vector<2x240xi1>, vector<2x240xi32>
    %c15_i32 = arith.constant 15 : i32
    %31 = vector.broadcast %c15_i32 : i32 to vector<2x240xi32>
    %32 = arith.cmpi ne, %30, %31 : vector<2x240xi32>
    %cst_10 = arith.constant 0.000000e+00 : f32
    %33 = vector.broadcast %cst_10 : f32 to vector<2x240xf32>
    %34 = arith.select %32, %13, %33 : vector<2x240xi1>, vector<2x240xf32>
    %cst_11 = arith.constant 0.000000e+00 : f32
    %35 = vector.broadcast %cst_11 : f32 to vector<2x17xf32>
    %cst_12 = arith.constant 0.000000e+00 : f32
    %36 = vector.broadcast %cst_12 : f32 to vector<2x31xf32>
    %37 = tpu.concatenate %35, %34, %36 in 1 : vector<2x17xf32>, vector<2x240xf32>, vector<2x31xf32> -> vector<2x288xf32>
    %38 = vector.extract_strided_slice %37 {offsets = [0, 0], sizes = [2, 256], strides = [1, 1]} : vector<2x288xf32> to vector<2x256xf32>
    %39 = vector.extract_strided_slice %37 {offsets = [0, 1], sizes = [2, 256], strides = [1, 1]} : vector<2x288xf32> to vector<2x256xf32>
    %40 = vector.extract_strided_slice %37 {offsets = [0, 16], sizes = [2, 256], strides = [1, 1]} : vector<2x288xf32> to vector<2x256xf32>
    %41 = vector.extract_strided_slice %37 {offsets = [0, 17], sizes = [2, 256], strides = [1, 1]} : vector<2x288xf32> to vector<2x256xf32>
    %42 = tpu.concatenate %38, %39, %40, %41 in 0 : vector<2x256xf32>, vector<2x256xf32>, vector<2x256xf32>, vector<2x256xf32> -> vector<8x256xf32>
    %c0_13 = arith.constant 0 : index
    %c0_14 = arith.constant 0 : index
    %43 = vector.load %arg4[%c0_13, %c0_14] : memref<4x8xf32, #tpu.memory_space<vmem>>, vector<4x8xf32>
    %cst_15 = arith.constant dense<0.000000e+00> : vector<4x256xf32>
    %44 = tpu.matmul %43, %42, %cst_15 {dimension_numbers = #tpu.dot_dimension_numbers<[1], [0], [0], [1], [0, 0, 1, 1], [], []>} : vector<4x8xf32>, vector<8x256xf32>, vector<4x256xf32> -> vector<4x256xf32>
    %c0_16 = arith.constant 0 : index
    %c0_17 = arith.constant 0 : index
    %45 = vector.load %arg5[%c0_16, %c0_17] : memref<4x1xf32, #tpu.memory_space<vmem>>, vector<4x1xf32>
    %46 = vector.broadcast %45 : vector<4x1xf32> to vector<4x256xf32>
    %47 = arith.addf %44, %46 : vector<4x256xf32>
    %c0_18 = arith.constant 0 : index
    %c0_19 = arith.constant 0 : index
    %c0_20 = arith.constant 0 : index
    %48 = vector.load %arg6[%c0_18, %c0_19, %c0_20] : memref<1x4x256xf32, #tpu.memory_space<vmem>>, vector<1x4x256xf32>
    %49 = vector.shape_cast %48 : vector<1x4x256xf32> to vector<4x256xf32>
    %50 = vector.shape_cast %47 : vector<4x256xf32> to vector<1x4x256xf32>
    tpu.vector_store %arg6[%c0_18, %c0_19, %c0_20], %50 {strides = array<i32>} : memref<1x4x256xf32, #tpu.memory_space<vmem>>, vector<1x4x256xf32>,
    return
  }
  func.func @transform_0(%arg0: i32) -> (i32, i32, i32) {
    %c0_i32 = arith.constant 0 : i32
    %c0_i32_0 = arith.constant 0 : i32
    %c0_i32_1 = arith.constant 0 : i32
    return %arg0, %c0_i32, %c0_i32_0 : i32, i32, i32
  }
  func.func @transform_1(%arg0: i32) -> (i32, i32) {
    %c0_i32 = arith.constant 0 : i32
    %c0_i32_0 = arith.constant 0 : i32
    %c0_i32_1 = arith.constant 0 : i32
    return %c0_i32, %c0_i32_0 : i32, i32
  }
  func.func @transform_2(%arg0: i32) -> (i32, i32) {
    %c0_i32 = arith.constant 0 : i32
    %c0_i32_0 = arith.constant 0 : i32
    %c0_i32_1 = arith.constant 0 : i32
    return %c0_i32, %c0_i32_0 : i32, i32
  }
  func.func @transform_3(%arg0: i32) -> (i32, i32) {
    %c0_i32 = arith.constant 0 : i32
    %c0_i32_0 = arith.constant 0 : i32
    %c0_i32_1 = arith.constant 0 : i32
    return %c0_i32, %c0_i32_0 : i32, i32
  }
  func.func @transform_4(%arg0: i32) -> (i32, i32) {
    %c0_i32 = arith.constant 0 : i32
    %c0_i32_0 = arith.constant 0 : i32
    %c0_i32_1 = arith.constant 0 : i32
    return %c0_i32, %c0_i32_0 : i32, i32
  }
  func.func @transform_5(%arg0: i32) -> (i32, i32, i32) {
    %c0_i32 = arith.constant 0 : i32
    %c0_i32_0 = arith.constant 0 : i32
    %c0_i32_1 = arith.constant 0 : i32
    return %arg0, %c0_i32, %c0_i32_0 : i32, i32, i32
  }
}

</mosaic_0001>

<bundles_post_ra>
// kernel: km2x2_forward.1
= control target key start
LH: loop header
LB: loop body
LE: loop exit
PB: predicated region body
PF: predicated region fallthrough
CT: control target
= control target key end

     0   :  { %s678_s18 = smov 0   ;;  %s745_s0 = inlined_call_operand.vmem [shape: f32[2,4,256], index: 0, kind: input, shape index: {}]   ;;  %s746_s1 = inlined_call_operand.vmem [shape: f32[2,16], index: 1, kind: input, shape index: {}]   ;;  %s747_s2 = inlined_call_operand.vmem [shape: f32[2,1], index: 2, kind: input, shape index: {}]   ;;  %s748_s3 = inlined_call_operand.vmem [shape: f32[4,8], index: 3, kind: input, shape index: {}]   ;;  %s749_s4 = inlined_call_operand.vmem [shape: f32[4,1], index: 4, kind: input, shape index: {}]   ;;  %s750_s5 = inlined_call_operand.vmem [shape: f32[2,4,256], index: 5, kind: output, shape index: {}]  }
   0x1 LB: > { %s583_s19 = sadd.s32 4294967295, %s640_s18   ;;  %p587_p0 = scmp.ge.s32.totalorder %s640_s18, 1  ;;  %s640_s18 = sphi %s678_s18, %s15_s18  }
   0x2   : > { %p187_p1 = scmp.lt.s32.totalorder %s640_s18, 3 }
   0x4   : > { %p188_p2 = pnand %p587_p0, %p187_p1 }
   0x5   : > { %p215_p3 = scmp.lt.s32.totalorder (!%p188_p2), %s583_s19, 1  ;;  %v642_v0 = vmov (!%p188_p2), 0.0   ;;  %s643_s24 = smov (!%p188_p2), 112   ;;  %v645_v8 = vmov (!%p188_p2), 0   ;;  %v266_v9 = vld [vmem:[%s747_s2] sm:$0x3] (!%p188_p2)  ;;  %v347_v31 = vlaneseq (!%p188_p2) }
   0x6   : > { %191 = sbr.rel (%p188_p2) target bundleno = 834 (0x342), region = 40  ;;  %340 = vmatprep.mubr.f32.mxu0 (!%p188_p2), %v642_v0  ;;  %516 = vmatprep.mubr.f32.mxu1 (!%p188_p2), %v642_v0  ;;  %v248_v1 = vrot.slane (!%p188_p2), %v642_v0, 4  ;;  %s644_s25 = smov (!%p188_p2), 111   ;;  %vm255_vm0 = vcmask (!%p188_p2), 908288   ;;  %vm243_vm1 = vcmask (!%p188_p2), 916480   ;;  %vm260_vm2 = vcmask (!%p188_p2), 1043456  }
   0x7   : > { %631 = vset.pattern.permute.xlu0 (!%p188_p2), %v645_v8  ;;  %632 = vset.pattern.permute.xlu1 (!%p188_p2), %v645_v8  ;;  %s646_s26 = smov (!%p188_p2), 127   ;;  %vm235_vm3 = vcmask (!%p188_p2), 1039360   ;;  %v265_v30 = vld [vmem:[%s746_s1] sm:$0x3] (!%p188_p2)  ;;  %vm272_vm4 = vcmask (!%p188_p2), 130048   ;;  %v348_v32 = vand.u32 (!%p188_p2), 127, %v347_v31 }
   0x8   : > { %s647_s6 = smov (!%p188_p2), 17   ;;  %vm384_vm7 = vcmask (!%p188_p2), 138240   ;;  %vm390_vm8 = vcmask (!%p188_p2), 7168   ;;  %v442_v56 = vld [vmem:[%s749_s4] sm:$0xf] (!%p188_p2)  ;;  %vm433_vm9 = vcmask (!%p188_p2), 1041408  }
   0x9   : > { %v354_v33 = vand.u32 (!%p188_p2), 15, %v348_v32  ;;  %v349_v34 = vadd.s32 (!%p188_p2), 128, %v348_v32  ;;  %vm438_vm10 = vcmask (!%p188_p2), 1045504   ;;  %vm448_vm11 = vcmask (!%p188_p2), 64512  }
   0xb   : > { %vm374_vm5 = vcmp.ne.s32.totalorder (!%p188_p2), %v354_v33, 15  ;;  %v361_v37 = vand.u32 (!%p188_p2), 15, %v349_v34 }
   0xd   : > { %s752_s19 = smov (!%p215_p3, %s583_s19), 1  ;;  %vm375_vm6 = vcmp.ne.s32.totalorder %v361_v37, 15 }
   0xe   : > { %s596_s20 = sshll.u32 %s752_s19, 3 }
   0xf   : > { %s219_s23 = scalar_lea.vmem %s745_s0, %s596_s20  ;;  %s224_s13 = scalar_lea.vmem %s750_s5, %s596_s20 }
  0x10   : > { %v225_v2 = vld [vmem:[%s219_s23] sm:$0xff] }
  0x11   : > { %v227_v3 = vcombine.high %v225_v2, %v225_v2  ;;  %v229_v4 = vrot.slane %v225_v2, 4 }
  0x13   : > { %v626_v5 = vpack.i.bf16 %v227_v3, %v225_v2  ;;  %v616_v6 = vpack.i.bf16 %v248_v1, %v227_v3  ;;  %v621_v7 = vpack.i.bf16 %v227_v3, %v229_v4 }
  0x15   : > { %627 = vrot.lane.b32.xlu1 %v626_v5, %s643_s24  ;;  %617 = vrot.lane.b32.xlu0 %v616_v6, %s644_s25 }
  0x19   : > { %249 = vrot.lane.b32.xlu1 %v229_v4, %s644_s25  ;;  %622 = vrot.lane.b32.xlu0 %v621_v7, %s646_s26 }
  0x1d   : > { %269 = vperm.xlu0 %631, %v266_v9  }
  0x87   : > { %v628_v10 = vpop.permute.xlu1 %627  ;;  %v618_v11 = vpop.permute.xlu0 %617 }
  0x88   : > { %v630_v12 = vunpack.i.h.bf16 %v628_v10  ;;  %v629_v13 = vunpack.i.l.bf16 %v628_v10  ;;  %v620_v14 = vunpack.i.h.bf16 %v618_v11  ;;  %v619_v15 = vunpack.i.l.bf16 %v618_v11 }
  0x8a   : > { %v257_v18 = vsel %vm255_vm0, %v619_v15, %v620_v14  ;;  %v244_v22 = vsel %vm243_vm1, %v629_v13, %v630_v12  ;;  %v441_v14 = vld [vmem:[%s748_s3] sm:$0xf] }
  0x8b   : > { %v250_v16 = vpop.permute.xlu1 %249  ;;  %v623_v17 = vpop.permute.xlu0 %622  ;;  %v264_v24 = vsel %vm260_vm2, %v630_v12, %v257_v18 }
  0x8c   : > { %v256_v19 = vsel %vm255_vm0, %v250_v16, %v619_v15  ;;  %v625_v20 = vunpack.i.h.bf16 %v623_v17  ;;  %v624_v21 = vunpack.i.l.bf16 %v623_v17 }
  0x8d   : > { %v263_v28 = vsel %vm260_vm2, %v244_v22, %v256_v19 }
  0x8e   : > { %v262_v23 = vsel %vm260_vm2, %v227_v3, %v625_v20  ;;  %v236_v25 = vsel %vm235_vm3, %v624_v21, %v625_v20 }
  0x8f   : > { %v598_v26 = vpack.c.bf16 %v264_v24, %v262_v23  ;;  %v261_v27 = vsel %vm260_vm2, %v225_v2, %v236_v25 }
  0x90   : > { %v600_v29 = vpack.c.bf16 %v263_v28, %v261_v27 }
  0x91   : > { %599 = vmatprep.subr.bf16.mxu0 %v598_v26 }
  0x92   : > { %601 = vmatpush1.bf16.msra.mxu0 %v600_v29 }
  0x95   : > { %592 = vmatmul.mubr.msk.f32.vlgmr.msra.gmra.mrb[0].mxu0 %vm272_vm4, %v265_v30 }
  0x9c   : > { %v270_v35 = vpop.permute.xlu0 %269 }
 0x168   : > { %v342_v36 = vpop.f32.mrb[0].mxu0 }
 0x169   : > { %v343_v38 = vadd.f32 %v342_v36, %v270_v35  ;;  %v344_v39 = vpop.f32.mrb[1].mxu0 }
 0x16a   : > { %v345_v40 = vadd.f32 %v344_v39, %v270_v35 }
 0x16b   : > { %v376_v41 = vsel %vm374_vm5, %v343_v38, 0.0 }
 0x16c   : > { %380 = vrot.lane.b32.xlu1 %v376_v41, %s647_s6  ;;  %v377_v42 = vsel %vm375_vm6, %v345_v40, 0.0 }
 0x170   : > { %382 = vrot.lane.b32.xlu1 %v377_v42, %s647_s6 }
 0x1de   : > { %v381_v43 = vpop.permute.xlu1 %380 }
 0x1df   : > { %v389_v44 = vsel %vm384_vm7, 0.0, %v381_v43 }
 0x1e0   : > { %v407_v45 = vrot.slane %v389_v44, 4  ;;  %v394_v46 = vrot.slane %v389_v44, 6  ;;  %v420_v57 = vrot.slane %v389_v44, 2 }
 0x1e2   : > { %410 = vrot.lane.b32.xlu1 %v407_v45, %s643_s24  ;;  %397 = vrot.lane.b32.xlu0 %v394_v46, %s646_s26  ;;  %v383_v47 = vpop.permute.xlu1 %382 }
 0x1e3   : > { %v385_v48 = vsel %vm384_vm7, %v381_v43, %v383_v47  ;;  %v391_v49 = vsel %vm390_vm8, %v383_v47, 0.0 }
 0x1e4   : > { %v396_v50 = vrot.slane %v391_v49, 6  ;;  %v395_v51 = vrot.slane %v385_v48, 6  ;;  %v408_v52 = vrot.slane %v385_v48, 4  ;;  %v409_v53 = vrot.slane %v391_v49, 4 }
 0x1e5   : > { %v422_v54 = vrot.slane %v391_v49, 2  ;;  %v421_v55 = vrot.slane %v385_v48, 2 }
 0x1e6   : > { %401 = vrot.lane.b32.xlu1 %v396_v50, %s646_s26  ;;  %399 = vrot.lane.b32.xlu0 %v395_v51, %s646_s26 }
 0x1ea   : > { %412 = vrot.lane.b32.xlu1 %v408_v52, %s643_s24  ;;  %414 = vrot.lane.b32.xlu0 %v409_v53, %s643_s24 }
 0x1ee   : > { %427 = vrot.lane.b32.xlu1 %v422_v54, %s644_s25  ;;  %425 = vrot.lane.b32.xlu0 %v421_v55, %s644_s25 }
 0x1f2   : > { %423 = vrot.lane.b32.xlu0 %v420_v57, %s644_s25  ;;  %445 = vperm.xlu1 %632, %v442_v56  }
 0x254   : > { %v398_v58 = vpop.permute.xlu0 %397  ;;  %v411_v59 = vpop.permute.xlu1 %410 }
 0x258   : > { %v400_v60 = vpop.permute.xlu0 %399  ;;  %v402_v61 = vpop.permute.xlu1 %401 }
 0x259   : > { %v404_v0 = vsel %vm235_vm3, %v400_v60, %v402_v61  ;;  %v403_v5 = vsel %vm235_vm3, %v398_v58, %v400_v60 }
 0x25a   : > { %v435_v2 = vsel %vm433_vm9, %v385_v48, %v404_v0  ;;  %v434_v10 = vsel %vm433_vm9, %v389_v44, %v403_v5 }
 0x25c   : > { %v415_v62 = vpop.permute.xlu0 %414  ;;  %v413_v63 = vpop.permute.xlu1 %412 }
 0x25d   : > { %v417_v1 = vsel %vm243_vm1, %v413_v63, %v415_v62  ;;  %v416_v8 = vsel %vm243_vm1, %v411_v59, %v413_v63 }
 0x25e   : > { %v437_v7 = vsel %vm260_vm2, %v435_v2, %v417_v1  ;;  %v436_v13 = vsel %vm260_vm2, %v434_v10, %v416_v8 }
 0x260   : > { %v426_v3 = vpop.permute.xlu0 %425  ;;  %v428_v4 = vpop.permute.xlu1 %427 }
 0x261   : > { %v430_v6 = vsel %vm255_vm0, %v426_v3, %v428_v4 }
 0x262   : > { %v440_v9 = vsel %vm438_vm10, %v437_v7, %v430_v6 }
 0x263   : > { %452 = vmatprep.subr.mxu1 %v440_v9 }
 0x264   : > { %v424_v11 = vpop.permute.xlu0 %423 }
 0x265   : > { %v429_v12 = vsel %vm255_vm0, %v424_v11, %v426_v3 }
 0x266   : > { %v439_v15 = vsel %vm438_vm10, %v436_v13, %v429_v12 }
 0x267   : > { %453 = vmatpush1.msra.mxu1 %v439_v15 }
 0x268   : > { %593 = vmatmul.mubr.msk.f32.vlgmr.msra.gmra.mrb[0].mxu1 %vm448_vm11, %v441_v14 }
 0x271   : > { %v446_v16 = vpop.permute.xlu1 %445 }
 0x33b   : > { %v518_v17 = vpop.f32.mrb[0].mxu1 }
 0x33c   : > { %v519_v18 = vadd.f32 %v518_v17, %v446_v16  ;;  %v520_v19 = vpop.f32.mrb[1].mxu1 }
 0x33d   : > { %v521_v20 = vadd.f32 %v520_v19, %v446_v16 }
 0x33f   : > { %v525_v21 = vcombine.low %v519_v18, %v521_v20 }
 0x341   : > { %527 = vst [vmem:[%s224_s13] sm:$0xff] %v525_v21 }
 0x342 PF: > { %s15_s18 = sadd.s32 1, %s640_s18  }
 0x343   : > { %p12_p4 = scmp.ge.s32.totalorder %s15_s18, 4  }
 0x345   :  { %14 = sbr.rel (!%p12_p4) target bundleno = 1 (0x1), region = 70 }

</bundles_post_ra>
